<compile_context>
chip_gen: v7x
topology: tpu7x:2x2x1
jax: 0.10.0
libtpu: 0.0.40
codegen_flags: <defaults>
</compile_context>

<pallas_src>
import jax
import jax.numpy as jnp
from jax.experimental import pallas as pl
from jax.experimental.pallas import tpu as pltpu


def _pos_grid_kernel(x_ref, pos_ref, o_ref):
    # x_ref:   (TB, F)  batch tile of flattened grids (F = R*C*E, lane-dense)
    # pos_ref: (1,  F)  precomputed row+col positional grid (resident in VMEM)
    # o_ref:   (TB, F)
    o_ref[...] = (x_ref[...] + pos_ref[...]).astype(o_ref.dtype)


def positional_grid_encode(
    x, row_embeddings, col_embeddings, *, target_tile_bytes=4 * 1024 * 1024
):
    """Adds row/col positional embeddings to x of shape [..., R, C, E]."""
    R, e_row = row_embeddings.shape
    C, e_col = col_embeddings.shape
    *lead, xr, xc, xe = x.shape
    assert xr == R, f"Expected {R} rows, got {xr}"
    assert xc == C, f"Expected {C} cols, got {xc}"
    assert xe == e_row == e_col, "Embedding dim mismatch"

    F = R * C * xe  # flattened per-grid size (2048 for 8x8x32 -> lane-dense)

    # Precompute the combined positional grid once (tiny: R*C*E elements),
    # accumulate in f32 for accuracy, then cast to x.dtype and flatten so the
    # kernel body is a single vadd against a VMEM-resident (1, F) row.
    combined = (
        row_embeddings.astype(jnp.float32)[:, None, :]
        + col_embeddings.astype(jnp.float32)[None, :, :]
    ).astype(x.dtype)
    combined_flat = combined.reshape((1, F))

    x_flat = x.reshape((-1, F))  # (B, F); B == 1 when there are no leading dims
    B = x_flat.shape[0]

    # Pick a batch-tile size giving ~target_tile_bytes per block.  Double
    # buffering of the in + out blocks (4x tile) stays well under the default
    # scoped-VMEM limit on every TPU generation.
    itemsize = jnp.dtype(x.dtype).itemsize
    rows_per_tile = max(1, target_tile_bytes // max(1, F * itemsize))
    if rows_per_tile >= B:
        TB = B  # single block covering the full (small) batch -> full extent OK
    else:
        # sublane-axis blocks must be a multiple of 8 when not the full extent
        TB = min(B, max(8, (rows_per_tile // 8) * 8))
    grid = (pl.cdiv(B, TB),)

    out_flat = pl.pallas_call(
        _pos_grid_kernel,
        out_shape=jax.ShapeDtypeStruct((B, F), x.dtype),
        grid=grid,
        in_specs=[
            pl.BlockSpec((TB, F), lambda i: (i, 0)),
            pl.BlockSpec((1, F), lambda i: (0, 0)),  # constant -> stays resident
        ],
        out_specs=pl.BlockSpec((TB, F), lambda i: (i, 0)),
        compiler_params=pltpu.CompilerParams(
            dimension_semantics=("parallel",),
        ),
    )(x_flat, combined_flat)

    return out_flat.reshape(x.shape)


if __name__ == "__main__":
    # Config mirrors the PyTorch module: n_embed=32, n_rows=8, n_cols=8
    n_embed, n_rows, n_cols = 32, 8, 8
    init_std = 0.02
    batch = 2

    key = jax.random.PRNGKey(0)
    k_x, k_row, k_col, k_x2 = jax.random.split(key, 4)

    x = jax.random.normal(k_x, (batch, n_rows, n_cols, n_embed), dtype=jnp.float32)
    row_embeddings = init_std * jax.random.normal(
        k_row, (n_rows, n_embed), dtype=jnp.float32
    )
    col_embeddings = init_std * jax.random.normal(
        k_col, (n_cols, n_embed), dtype=jnp.float32
    )

    out = positional_grid_encode(x, row_embeddings, col_embeddings)
    out = jax.block_until_ready(out)

    # Reference check (pure JAX broadcast, mirrors the PyTorch forward)
    ref = x + row_embeddings[None, :, None, :] + col_embeddings[None, None, :, :]
    assert out.shape == x.shape
    assert jnp.allclose(out, ref, atol=1e-6), "Mismatch vs reference (4D)"

    # Also exercise an extra leading dim ([seq, batch, R, C, E]) like the module.
    x5 = jax.random.normal(
        k_x2, (3, batch, n_rows, n_cols, n_embed), dtype=jnp.float32
    )
    out5 = jax.block_until_ready(
        positional_grid_encode(x5, row_embeddings, col_embeddings)
    )
    ref5 = (
        x5
        + row_embeddings[None, None, :, None, :]
        + col_embeddings[None, None, None, :, :]
    )
    assert out5.shape == x5.shape
    assert jnp.allclose(out5, ref5, atol=1e-6), "Mismatch vs reference (5D)"

    # 3D case ([R, C, E], no leading dims) is also supported by the module.
    x3 = x[0]
    out3 = jax.block_until_ready(
        positional_grid_encode(x3, row_embeddings, col_embeddings)
    )
    ref3 = x3 + row_embeddings[:, None, :] + col_embeddings[None, :, :]
    assert out3.shape == x3.shape
    assert jnp.allclose(out3, ref3, atol=1e-6), "Mismatch vs reference (3D)"

    print("KERNEL_OK")
</pallas_src>

<mosaic_0001>
module attributes {stable_mosaic.version = 11 : i64} {
  func.func @_pos_grid_kernel(%arg0: i32, %arg1: memref<2x2048xf32, #tpu.memory_space<vmem>>, %arg2: memref<1x2048xf32, #tpu.memory_space<vmem>>, %arg3: memref<2x2048xf32, #tpu.memory_space<vmem>>) attributes {dimension_semantics = [#tpu.dimension_semantics<parallel>], iteration_bounds = array<i64: 1>, scalar_prefetch = 0 : i64, scratch_operands = 0 : i64, tpu.core_type = #tpu.core_type<tc>, window_params = [{transform_indices = @transform_0, window_bounds = array<i64: 2, 2048>}, {pipeline_mode = #tpu.pipeline_mode<synchronous>, transform_indices = @transform_1, window_bounds = array<i64: 1, 2048>}, {transform_indices = @transform_2, window_bounds = array<i64: 2, 2048>}]} {
    %c0 = arith.constant 0 : index
    %c0_0 = arith.constant 0 : index
    %0 = vector.load %arg1[%c0, %c0_0] : memref<2x2048xf32, #tpu.memory_space<vmem>>, vector<2x2048xf32>
    %c0_1 = arith.constant 0 : index
    %c0_2 = arith.constant 0 : index
    %1 = vector.load %arg2[%c0_1, %c0_2] : memref<1x2048xf32, #tpu.memory_space<vmem>>, vector<1x2048xf32>
    %2 = vector.broadcast %1 : vector<1x2048xf32> to vector<2x2048xf32>
    %3 = arith.addf %0, %2 : vector<2x2048xf32>
    %c0_3 = arith.constant 0 : index
    %c0_4 = arith.constant 0 : index
    %4 = vector.load %arg3[%c0_3, %c0_4] : memref<2x2048xf32, #tpu.memory_space<vmem>>, vector<2x2048xf32>
    tpu.vector_store %arg3[%c0_3, %c0_4], %3 {strides = array<i32>} : memref<2x2048xf32, #tpu.memory_space<vmem>>, vector<2x2048xf32>,
    return
  }
  func.func @transform_0(%arg0: i32) -> (i32, i32) {
    %c0_i32 = arith.constant 0 : i32
    %c0_i32_0 = arith.constant 0 : i32
    return %arg0, %c0_i32 : i32, i32
  }
  func.func @transform_1(%arg0: i32) -> (i32, i32) {
    %c0_i32 = arith.constant 0 : i32
    %c0_i32_0 = arith.constant 0 : i32
    %c0_i32_1 = arith.constant 0 : i32
    return %c0_i32, %c0_i32_0 : i32, i32
  }
  func.func @transform_2(%arg0: i32) -> (i32, i32) {
    %c0_i32 = arith.constant 0 : i32
    %c0_i32_0 = arith.constant 0 : i32
    return %arg0, %c0_i32 : i32, i32
  }
}

</mosaic_0001>

<bundles_post_ra>
// kernel: tpu_custom_call.1
= control target key start
LH: loop header
LB: loop body
LE: loop exit
PB: predicated region body
PF: predicated region fallthrough
CT: control target
= control target key end

     0   :  { %7 = vsyncpa [#allocation3], 0  ;;  %s335_s0 = inlined_call_operand.hbm [shape: f32[2,2048], index: 0, kind: input, shape index: {}]   ;;  %s336_s1 = inlined_call_operand.hbm [shape: f32[1,2048], index: 1, kind: input, shape index: {}]   ;;  %s337_s2 = inlined_call_operand.hbm [shape: f32[2,2048], index: 2, kind: output, shape index: {}]  }
   0x1   :  { %8 = vsyncpa [#allocation6], 0 }
   0x2   :  { %9 = vsyncpa [#allocation4], 0  ;;  %s280_s9 = smov [#allocation2]   ;;  %s281_s11 = smov [#allocation5]  }
   0x3   :  { %s16_s10 = sshll.u32 %s280_s9, 4  ;;  %s26_s12 = sshll.u32 %s281_s11, 4  ;;  %s17_s10 = int_to_ptr.vmem [resolvable:$true] %s16_s10  ;;  %s27_s12 = int_to_ptr.vmem [resolvable:$true] %s26_s12 }
   0x4   :  { %s208_s15 = scalar_lea.hbm %s335_s0, 512 }
   0x5   :  { %p209_p0 = scmp.ne.s32.totalorder %s335_s0, %s208_s15  ;;  %p212_p1 = scmp.lt.u32.totalorder %s208_s15, %s335_s0 }
   0x7   :  { %p214_p2 = pnand %p212_p1, %p209_p0 }
   0x9   :  { %217 = shalt.err (!%p214_p2)
}
   0xa   :  { %s218_s20 = scalar_lea.vmem %s17_s10, 512  ;;  %p223_p4 = scmp.lt.s32.totalorder %s17_s10, %s17_s10 }
   0xb   :  { %p219_p3 = scmp.ne.s32.totalorder %s17_s10, %s218_s20  ;;  %p224_p5 = scmp.lt.s32.totalorder %s218_s20, %s218_s20 }
   0xd   :  { %p225_p6 = por %p224_p5, %p223_p4 }
   0xf   :  { %p226_p7 = pnand %p225_p6, %p219_p3 }
  0x11   :  { %229 = shalt.err (!%p226_p7)
}
  0x12   :  { %19 = dma.hbm_to_vmem [thread:$0]  %s335_s0, 512, %s17_s10, [#allocation3]  }
  0x13   :  { %s230_s25 = scalar_lea.hbm %s336_s1, 256 }
  0x14   :  { %p231_p8 = scmp.ne.s32.totalorder %s336_s1, %s230_s25  ;;  %p234_p9 = scmp.lt.u32.totalorder %s230_s25, %s336_s1 }
  0x16   :  { %p236_p10 = pnand %p234_p9, %p231_p8 }
  0x18   :  { %239 = shalt.err (!%p236_p10)
}
  0x19   :  { %s240_s30 = scalar_lea.vmem %s27_s12, 256  ;;  %p245_p12 = scmp.lt.s32.totalorder %s27_s12, %s27_s12 }
  0x1a   :  { %p241_p11 = scmp.ne.s32.totalorder %s27_s12, %s240_s30  ;;  %p246_p13 = scmp.lt.s32.totalorder %s240_s30, %s240_s30 }
  0x1c   :  { %p247_p0 = por %p246_p13, %p245_p12 }
  0x1e   :  { %p248_p1 = pnand %p247_p0, %p241_p11 }
  0x20   :  { %251 = shalt.err (!%p248_p1)
}
  0x21   :  { %29 = dma.hbm_to_vmem [thread:$0]  %s336_s1, 256, %s27_s12, [#allocation6]  }
  0x22   :  { %274 = dma.done.wait [#allocation3], 512  }
  0x23   :  { %275 = vsyncadd [#allocation3], 4294966784 }
  0x24   :  { %276 = dma.done.wait [#allocation6], 256  }
  0x25   :  { %277 = vsyncadd [#allocation6], 4294967040  ;;  %v44_v0 = vlaneseq  ;;  %v282_v1 = vmov 1983009808   ;;  %v40_v13 = vld [vmem:[#allocation5] sm:$0xff]  ;;  %v41_v19 = vld [vmem:[#allocation5 + $0x8] sm:$0xff] }
  0x26   :  { %v111_v2 = vunpack.c.l.s4 %v282_v1  ;;  %v36_v36 = vld [vmem:[#allocation2] sm:$0xff]  ;;  %v37_v42 = vld [vmem:[#allocation2 + $0x8] sm:$0xff]  ;;  %v38_v50 = vld [vmem:[#allocation2 + $0x10] sm:$0xff]  ;;  %s283_s1 = smov [#allocation7]  }
  0x27   :  { %v45_v3 = vshrl.u32 %v44_v0, 7  ;;  %v39_v57 = vld [vmem:[#allocation2 + $0x18] sm:$0xff]  ;;  %s194_s4 = sshll.u32 %s283_s1, 4  ;;  %s195_s4 = int_to_ptr.vmem [resolvable:$true] %s194_s4 }
  0x28   :  { %v112_v4 = vunpack.c.0.s8 %v111_v2  ;;  %s252_s5 = scalar_lea.vmem %s195_s4, 512  ;;  %p257_p3 = scmp.lt.s32.totalorder %s195_s4, %s195_s4 }
  0x29   :  { %v46_v5 = vsub.s32 0, %v45_v3  ;;  %v50_v6 = vsub.s32 1, %v45_v3  ;;  %v54_v7 = vsub.s32 2, %v45_v3  ;;  %v58_v8 = vsub.s32 3, %v45_v3  ;;  %p253_p2 = scmp.ne.s32.totalorder %s195_s4, %s252_s5  ;;  %p258_p4 = scmp.lt.s32.totalorder %s252_s5, %s252_s5 }
  0x2a   :  { %v62_v9 = vsub.s32 4, %v45_v3  ;;  %v66_v10 = vsub.s32 5, %v45_v3  ;;  %v70_v11 = vsub.s32 6, %v45_v3  ;;  %v74_v12 = vsub.s32 7, %v45_v3 }
  0x2b   :  { %v115_v14 = vsub.s32 %v112_v4, %v45_v3  ;;  %v47_v15 = vrot.slane %v40_v13, %v46_v5  ;;  %v51_v16 = vrot.slane %v40_v13, %v50_v6  ;;  %v55_v17 = vrot.slane %v40_v13, %v54_v7  ;;  %p259_p5 = por %p258_p4, %p257_p3 }
  0x2c   :  { %v59_v18 = vrot.slane %v40_v13, %v58_v8  ;;  %v63_v20 = vrot.slane %v40_v13, %v62_v9  ;;  %v67_v21 = vrot.slane %v40_v13, %v66_v10  ;;  %v71_v22 = vrot.slane %v40_v13, %v70_v11 }
  0x2d   :  { %v75_v23 = vrot.slane %v40_v13, %v74_v12  ;;  %v108_v24 = vcombine.low %v47_v15, %v51_v16  ;;  %v79_v26 = vrot.slane %v41_v19, %v46_v5  ;;  %v83_v27 = vrot.slane %v41_v19, %v50_v6  ;;  %p260_p6 = pnand %p259_p5, %p253_p2 }
  0x2e   :  { %v109_v25 = vcombine.low %v55_v17, %v59_v18  ;;  %v125_v28 = vcombine.low %v63_v20, %v67_v21  ;;  %v87_v30 = vrot.slane %v41_v19, %v54_v7  ;;  %v91_v31 = vrot.slane %v41_v19, %v58_v8 }
  0x2f   :  { %v126_v29 = vcombine.low %v71_v22, %v75_v23  ;;  %v116_v32 = vrot.slane %v108_v24, %v115_v14  ;;  %v142_v34 = vcombine.low %v79_v26, %v83_v27  ;;  %v95_v35 = vrot.slane %v41_v19, %v62_v9 }
  0x30   :  { %v123_v33 = vrot.slane %v109_v25, %v115_v14  ;;  %v133_v37 = vrot.slane %v125_v28, %v115_v14  ;;  %v143_v39 = vcombine.low %v87_v30, %v91_v31  ;;  %v99_v40 = vrot.slane %v41_v19, %v66_v10 }
  0x31   :  { %v140_v38 = vrot.slane %v126_v29, %v115_v14  ;;  %v150_v43 = vrot.slane %v142_v34, %v115_v14  ;;  %v103_v44 = vrot.slane %v41_v19, %v70_v11  ;;  %v107_v45 = vrot.slane %v41_v19, %v74_v12 }
  0x32   :  { %v124_v41 = vcombine.low %v116_v32, %v123_v33  ;;  %v157_v47 = vrot.slane %v143_v39, %v115_v14  ;;  %v159_v48 = vcombine.low %v95_v35, %v99_v40 }
  0x33   :  { %v141_v46 = vcombine.low %v133_v37, %v140_v38  ;;  %v160_v51 = vcombine.low %v103_v44, %v107_v45 }
  0x34   :  { %v180_v49 = vadd.f32 %v124_v41, %v36_v36  ;;  %v158_v53 = vcombine.low %v150_v43, %v157_v47  ;;  %v167_v54 = vrot.slane %v159_v48, %v115_v14 }
  0x35   :  { %v181_v52 = vadd.f32 %v141_v46, %v37_v42  ;;  %v174_v55 = vrot.slane %v160_v51, %v115_v14 }
  0x36   :  { %184 = vst [vmem:[#allocation7] sm:$0xff] %v180_v49  ;;  %v182_v56 = vadd.f32 %v158_v53, %v38_v50 }
  0x37   :  { %185 = vst [vmem:[#allocation7 + $0x8] sm:$0xff] %v181_v52  ;;  %v175_v58 = vcombine.low %v167_v54, %v174_v55 }
  0x38   :  { %186 = vst [vmem:[#allocation7 + $0x10] sm:$0xff] %v182_v56 }
  0x39   :  { %v183_v59 = vadd.f32 %v175_v58, %v39_v57 }
  0x3b   :  { %187 = vst [vmem:[#allocation7 + $0x18] sm:$0xff] %v183_v59 }
  0x3c   :  { %263 = shalt.err (!%p260_p6)
}
  0x3d   :  { %s264_s8 = scalar_lea.hbm %s337_s2, 512 }
  0x3e   :  { %p265_p7 = scmp.ne.s32.totalorder %s337_s2, %s264_s8  ;;  %p268_p8 = scmp.lt.u32.totalorder %s264_s8, %s337_s2 }
  0x40   :  { %p270_p9 = pnand %p268_p8, %p265_p7 }
  0x42   :  { %273 = shalt.err (!%p270_p9)
}
  0x43   :  { %197 = dma.vmem_to_hbm [thread:$0]  %s195_s4, 512, %s337_s2, [#allocation4]  }
  0x44   :  { %278 = dma.done.wait [#allocation4], 512  }
  0x45   :  { %279 = vsyncadd [#allocation4], 4294966784 }
  0x46   :  { %201 = vsyncpa [#allocation3], 1 }
  0x47   :  { %202 = vsyncpa [#allocation6], 1 }
  0x48   :  { %203 = vsyncpa [#allocation4], 1 }

</bundles_post_ra>
